<compile_context>
chip_gen: v7x
topology: tpu7x:2x2x1
jax: 0.10.0
libtpu: 0.0.40
codegen_flags: <defaults>
</compile_context>

<pallas_src>
import functools

import jax
import jax.numpy as jnp
from jax.experimental import pallas as pl
from jax.experimental.pallas import tpu as pltpu


def _kd_tile_kernel(inp_ref, tgt_ref, out_ref, *, inv_temp, batch_size,
                    batch_tile, needs_mask):
    """Per-tile KL(q || p) partial sum for one (batch_tile, C) block of logits.

    row_kl = sum_c t_exp * (t_sh - x_sh) / t_sum + lse_x - log(t_sum)
    == sum_c q * (log q - log p) without materializing q, log_q or log_p.
    """
    x = inp_ref[...].astype(jnp.float32) * inv_temp
    t = tgt_ref[...].astype(jnp.float32) * inv_temp

    # Log-sum-exp of x over the class (lane) axis; log_p never materialized.
    x_max = jnp.max(x, axis=-1, keepdims=True)
    x_sh = x - x_max
    lse_x = jnp.log(jnp.sum(jnp.exp(x_sh), axis=-1, keepdims=True))

    # Unnormalized softmax(target / T) statistics over the class axis.
    t_max = jnp.max(t, axis=-1, keepdims=True)
    t_sh = t - t_max
    t_exp = jnp.exp(t_sh)
    t_sum = jnp.sum(t_exp, axis=-1, keepdims=True)

    # TODO(synk): if a bundle dump shows the VALU/vst slot saturating (bf16
    # inputs on v6e/v7x), offload these three class-axis sums to the idle MXU
    # via jnp.dot(tmp, ones((C, 1)), preferred_element_type=jnp.float32).
    num = jnp.sum(t_exp * (t_sh - x_sh), axis=-1, keepdims=True)
    row_kl = num / t_sum + lse_x - jnp.log(t_sum)          # (bt, 1)

    if needs_mask:
        # Zero rows >= B of the trailing partial block (they read unspecified
        # data); must happen BEFORE the in-tile sum.
        row0 = pl.program_id(0) * batch_tile
        rows = row0 + jax.lax.broadcasted_iota(jnp.int32, (batch_tile, 1), 0)
        row_kl = jnp.where(rows < batch_size, row_kl, 0.0)

    tile_sum = jnp.sum(row_kl, axis=0, keepdims=True)       # (1, 1)
    out_ref[...] = tile_sum[None]                            # (1, 1, 1)


def _vmem_budget_and_limit():
    """Generation-aware tiling budget and scoped-VMEM limit (bytes)."""
    cap = 64 * 1024 * 1024          # conservative fallback (v7x per-TC VMEM)
    try:
        info = pltpu.get_tpu_info()
        cap = int(getattr(info, "vmem_capacity_bytes", cap))
    except Exception:
        pass
    limit = min((cap * 3) // 4, 100 * 1024 * 1024)   # 96 MiB v5e/v6e, 48 MiB v7x
    budget = limit // 2                               # 48 MiB v5e/v6e, 24 MiB v7x
    return budget, limit


def _pick_batch_tile(B, C, in_itemsize, budget):
    """Largest 8-aligned batch tile whose working set fits `budget` bytes.

    Per row: 2 inputs x 2 pipeline buffers in the input dtype plus ~7 live
    f32 (bt, C) temporaries (conservative; log_p is never materialized).
    """
    bytes_per_row = C * (4 * in_itemsize + 28) + 64
    bt = budget // max(bytes_per_row, 1)
    bt = max(8, min(int(bt), 1024))
    bt = (bt // 8) * 8
    # Ensure the "parallel" grid axis has >= 2 steps (v7x has 2 TensorCores).
    if B > 8:
        half = (((B + 1) // 2) + 7) // 8 * 8
        bt = min(bt, half)
    # Don't tile beyond the (8-aligned) batch itself.
    bt = min(bt, ((B + 7) // 8) * 8)
    return max(8, (bt // 8) * 8)


def kd_loss(inp, tgt, temp_factor, *, batch_tile=None):
    """Pallas implementation of KDLoss.forward for (B, C) logits."""
    assert inp.shape == tgt.shape and inp.ndim == 2
    B, C = inp.shape
    # TODO(synk): for vocab-scale C (>64k), add an inner "arbitrary" grid axis
    # over C with an online/two-pass log-sum-exp instead of a full (bt, C) block.

    in_itemsize = jnp.dtype(inp.dtype).itemsize
    budget, vmem_limit = _vmem_budget_and_limit()
    bt = _pick_batch_tile(B, C, in_itemsize, budget) if batch_tile is None else batch_tile
    assert bt % 8 == 0 and bt >= 8

    num_tiles = -(-B // bt)                    # cdiv; no jnp.pad HBM round-trip
    needs_mask = (B % bt) != 0

    kernel = functools.partial(
        _kd_tile_kernel,
        inv_temp=1.0 / float(temp_factor),
        batch_size=B,
        batch_tile=bt,
        needs_mask=needs_mask,
    )

    cost = pl.CostEstimate(
        flops=12 * B * C,
        transcendentals=2 * B * C,
        bytes_accessed=2 * B * C * in_itemsize + 4 * num_tiles,
    )

    partials = pl.pallas_call(
        kernel,
        out_shape=jax.ShapeDtypeStruct((num_tiles, 1, 1), jnp.float32),
        grid_spec=pltpu.PrefetchScalarGridSpec(
            num_scalar_prefetch=0,
            grid=(num_tiles,),
            in_specs=[
                pl.BlockSpec((bt, C), lambda i: (i, 0)),
                pl.BlockSpec((bt, C), lambda i: (i, 0)),
            ],
            out_specs=pl.BlockSpec((1, 1, 1), lambda i: (i, 0, 0)),
        ),
        compiler_params=pltpu.CompilerParams(
            dimension_semantics=("parallel",),    # megacore sharding on v7x
            vmem_limit_bytes=vmem_limit,          # generation-aware
        ),
        cost_estimate=cost,
    )(inp, tgt)

    scale = float(temp_factor) ** 2 / float(B)    # PyTorch divides by input.size(0)
    return jnp.sum(partials) * scale


def _kd_loss_ref(inp, tgt, temp_factor):
    """Pure-JAX reference mirroring the PyTorch module."""
    B = inp.shape[0]
    log_p = jax.nn.log_softmax(inp.astype(jnp.float32) / temp_factor, axis=1)
    q = jax.nn.softmax(tgt.astype(jnp.float32) / temp_factor, axis=1)
    kl = jnp.sum(q * (jnp.log(q) - log_p))
    return kl * temp_factor**2 / B


if __name__ == "__main__":
    temp_factor = 4.0
    B, C = 16, 32  # small (batch, num_classes) logits

    key = jax.random.PRNGKey(0)
    k1, k2 = jax.random.split(key)
    student_logits = jax.random.normal(k1, (B, C), dtype=jnp.float32)
    teacher_logits = jax.random.normal(k2, (B, C), dtype=jnp.float32)

    loss = kd_loss(student_logits, teacher_logits, temp_factor)
    jax.block_until_ready(loss)

    ref = _kd_loss_ref(student_logits, teacher_logits, temp_factor)
    assert jnp.allclose(loss, ref, rtol=1e-5, atol=1e-5), (loss, ref)

    print("KERNEL_OK")
</pallas_src>

<mosaic_0001>
module attributes {stable_mosaic.version = 11 : i64} {
  func.func @_kd_tile_kernel(%arg0: i32, %arg1: memref<8x32xf32, #tpu.memory_space<vmem>>, %arg2: memref<8x32xf32, #tpu.memory_space<vmem>>, %arg3: memref<1x1x1xf32, #tpu.memory_space<vmem>>) attributes {dimension_semantics = [#tpu.dimension_semantics<parallel>], iteration_bounds = array<i64: 2>, scalar_prefetch = 0 : i64, scratch_operands = 0 : i64, tpu.core_type = #tpu.core_type<tc>, window_params = [{transform_indices = @transform_0, window_bounds = array<i64: 8, 32>}, {transform_indices = @transform_1, window_bounds = array<i64: 8, 32>}, {transform_indices = @transform_2, window_bounds = array<i64: 1, 1, 1>}]} {
    %c0 = arith.constant 0 : index
    %c0_0 = arith.constant 0 : index
    %0 = vector.load %arg1[%c0, %c0_0] : memref<8x32xf32, #tpu.memory_space<vmem>>, vector<8x32xf32>
    %cst = arith.constant 2.500000e-01 : f32
    %1 = vector.broadcast %cst : f32 to vector<8x32xf32>
    %2 = arith.mulf %0, %1 : vector<8x32xf32>
    %c0_1 = arith.constant 0 : index
    %c0_2 = arith.constant 0 : index
    %3 = vector.load %arg2[%c0_1, %c0_2] : memref<8x32xf32, #tpu.memory_space<vmem>>, vector<8x32xf32>
    %cst_3 = arith.constant 2.500000e-01 : f32
    %4 = vector.broadcast %cst_3 : f32 to vector<8x32xf32>
    %5 = arith.mulf %3, %4 : vector<8x32xf32>
    %cst_4 = arith.constant dense<0xFF800000> : vector<8xf32>
    %6 = vector.multi_reduction <maximumf>, %2, %cst_4 [1] : vector<8x32xf32> to vector<8xf32>
    %7 = vector.shape_cast %6 : vector<8xf32> to vector<8x1xf32>
    %8 = vector.broadcast %7 : vector<8x1xf32> to vector<8x32xf32>
    %9 = arith.subf %2, %8 : vector<8x32xf32>
    %10 = math.exp %9 : vector<8x32xf32>
    %cst_5 = arith.constant dense<0.000000e+00> : vector<8xf32>
    %11 = vector.multi_reduction <add>, %10, %cst_5 [1] : vector<8x32xf32> to vector<8xf32>
    %12 = vector.shape_cast %11 : vector<8xf32> to vector<8x1xf32>
    %13 = math.log %12 : vector<8x1xf32>
    %cst_6 = arith.constant dense<0xFF800000> : vector<8xf32>
    %14 = vector.multi_reduction <maximumf>, %5, %cst_6 [1] : vector<8x32xf32> to vector<8xf32>
    %15 = vector.shape_cast %14 : vector<8xf32> to vector<8x1xf32>
    %16 = vector.broadcast %15 : vector<8x1xf32> to vector<8x32xf32>
    %17 = arith.subf %5, %16 : vector<8x32xf32>
    %18 = math.exp %17 : vector<8x32xf32>
    %cst_7 = arith.constant dense<0.000000e+00> : vector<8xf32>
    %19 = vector.multi_reduction <add>, %18, %cst_7 [1] : vector<8x32xf32> to vector<8xf32>
    %20 = vector.shape_cast %19 : vector<8xf32> to vector<8x1xf32>
    %21 = arith.subf %17, %9 : vector<8x32xf32>
    %22 = arith.mulf %18, %21 : vector<8x32xf32>
    %cst_8 = arith.constant dense<0.000000e+00> : vector<8xf32>
    %23 = vector.multi_reduction <add>, %22, %cst_8 [1] : vector<8x32xf32> to vector<8xf32>
    %24 = vector.shape_cast %23 : vector<8xf32> to vector<8x1xf32>
    %25 = arith.divf %24, %20 : vector<8x1xf32>
    %26 = arith.addf %25, %13 : vector<8x1xf32>
    %27 = math.log %20 : vector<8x1xf32>
    %28 = arith.subf %26, %27 : vector<8x1xf32>
    %cst_9 = arith.constant dense<0.000000e+00> : vector<1xf32>
    %29 = vector.multi_reduction <add>, %28, %cst_9 [0] : vector<8x1xf32> to vector<1xf32>
    %30 = vector.shape_cast %29 : vector<1xf32> to vector<1x1xf32>
    %31 = vector.shape_cast %30 : vector<1x1xf32> to vector<1x1x1xf32>
    %c0_10 = arith.constant 0 : index
    %c0_11 = arith.constant 0 : index
    %c0_12 = arith.constant 0 : index
    %32 = vector.load %arg3[%c0_10, %c0_11, %c0_12] : memref<1x1x1xf32, #tpu.memory_space<vmem>>, vector<1x1x1xf32>
    tpu.vector_store %arg3[%c0_10, %c0_11, %c0_12], %31 {strides = array<i32>} : memref<1x1x1xf32, #tpu.memory_space<vmem>>, vector<1x1x1xf32>,
    return
  }
  func.func @transform_0(%arg0: i32) -> (i32, i32) {
    %c0_i32 = arith.constant 0 : i32
    %c0_i32_0 = arith.constant 0 : i32
    return %arg0, %c0_i32 : i32, i32
  }
  func.func @transform_1(%arg0: i32) -> (i32, i32) {
    %c0_i32 = arith.constant 0 : i32
    %c0_i32_0 = arith.constant 0 : i32
    return %arg0, %c0_i32 : i32, i32
  }
  func.func @transform_2(%arg0: i32) -> (i32, i32, i32) {
    %c0_i32 = arith.constant 0 : i32
    %c0_i32_0 = arith.constant 0 : i32
    %c0_i32_1 = arith.constant 0 : i32
    return %arg0, %c0_i32, %c0_i32_0 : i32, i32, i32
  }
}

</mosaic_0001>

<bundles_post_ra>
// kernel: tpu_custom_call.1
= control target key start
LH: loop header
LB: loop body
LE: loop exit
PB: predicated region body
PF: predicated region fallthrough
CT: control target
= control target key end

     0   :  { %7 = vsyncpa [#allocation3], 0  ;;  %s662_s0 = inlined_call_operand.hbm [shape: f32[16,32], index: 0, kind: input, shape index: {}]   ;;  %s663_s1 = inlined_call_operand.hbm [shape: f32[16,32], index: 1, kind: input, shape index: {}]   ;;  %s664_s2 = inlined_call_operand.vmem [shape: f32[2,1,1], index: 2, kind: output, shape index: {}]  }
   0x1   :  { %9 = vsyncpa [#allocation3 + $0x1], 0 }
   0x2   :  { %10 = vsyncpa [#allocation5], 0 }
   0x3   :  { %12 = vsyncpa [#allocation5 + $0x1], 0  ;;  %s503_s9 = smov 0   ;;  %s505_s10 = smov 0  }
   0x4   :  { %s507_s11 = smov 0   ;;  %s509_s12 = smov 0  }
   0x5 LB: > { %s522_s13 = sadd.s32 4294967295, %s484_s12   ;;  %s525_s14 = sadd.s32 1, %s484_s12   ;;  %s484_s12 = sphi %s509_s12, %s676_s12   ;;  %s480_s11 = sphi %s507_s11, %s675_s11   ;;  %s476_s10 = sphi %s505_s10, %s674_s10   ;;  %s472_s9 = sphi %s503_s9, %s673_s9  }
   0x6   : > { %s22_s15 = ssub.s32 %s484_s12, %s525_s14  ;;  %s25_s16 = sadd.s32 1, %s480_s11 }
   0x7   : > { %p23_p0 = scmp.eq.s32.totalorder %s22_s15, 0  ;;  %p32_p1 = scmp.ne.s32.totalorder %s480_s11, %s476_s10 }
   0x8   : > { %p33_p2 = scmp.eq.s32.totalorder %s484_s12, 0  ;;  %p38_p3 = scmp.ne.s32.totalorder %s476_s10, %s472_s9 }
   0x9   : > { %s535_s17 = scalar_select %p23_p0, %s480_s11, %s25_s16  }
   0xa   : > { %p34_p4 = por %p33_p2, %p32_p1  ;;  %p39_p5 = scmp.eq.s32.totalorder %s522_s13, 0 }
   0xb   : > { %p343_p6 = scmp.lt.s32.totalorder %s484_s12, 2  ;;  %s544_s19 = sand.u32 1, %s480_s11  }
   0xc   : > { %p539_p7 = por %p39_p5, %p38_p3  ;;  %s323_s20 = sshll.u32 %s544_s19, 3 }
   0xd   : > { %s324_s21 = sshll.u32 %s484_s12, 7  ;;  %s118_s25 = scalar_lea.vmem [#allocation2], %s323_s20 }
   0xe   : > { %s666_s18 = scalar_select %p539_p7, 1, 0 }
   0xf   : > { %s553_s24 = scalar_lea.hbm %s662_s0, %s324_s21  ;;  %s125_s26 = sshll.u32 %s118_s25, 4  ;;  %s557_s26 = int_to_ptr.vmem [resolvable:$true] %s125_s26 }
  0x10   : > { %p559_p8 = pnand %p343_p6, %p34_p4  ;;  %s115_s28 = scalar_lea.sflag [#allocation3], %s544_s19 }
  0x11   : > { %s386_s29 = scalar_lea.hbm %s553_s24, 128  ;;  %s391_s4 = scalar_lea.hbm %s662_s0, 256 }
  0x12   : > { %p387_p11 = scmp.ne.s32.totalorder %s553_s24, %s386_s29  ;;  %p388_p12 = pneg %p559_p8 }
  0x13   : > { %p392_p1 = scmp.lt.u32.totalorder %s553_s24, %s662_s0  ;;  %p393_p2 = scmp.lt.u32.totalorder %s391_s4, %s386_s29 }
  0x14   : > { %p389_p13 = pnand %p388_p12, %p387_p11  ;;  %p395_p4 = scmp.lt.u32.totalorder %s386_s29, %s553_s24 }
  0x15   : > { %p394_p3 = por %p393_p2, %p392_p1 }
  0x16   : > { %p390_p0 = pneg %p389_p13 }
  0x17   : > { %p396_p5 = por %p395_p4, %p394_p3 }
  0x19   : > { %p397_p6 = pnand %p396_p5, %p390_p0 }
  0x1b   : > { %400 = shalt.err (!%p397_p6)
}
  0x1c   : > { %s401_s7 = scalar_lea.vmem %s557_s26, 128  ;;  %s486_s8 = smov [#allocation2]  }
  0x1d   : > { %p402_p11 = scmp.ne.s32.totalorder %s557_s26, %s401_s7  ;;  %s406_s9 = sshll.u32 %s486_s8, 4  ;;  %s407_s9 = int_to_ptr.vmem [resolvable:$false] %s406_s9 }
  0x1e   : > { %s408_s15 = scalar_lea.vmem %s407_s9, 256  ;;  %p409_p10 = scmp.lt.s32.totalorder %s557_s26, %s407_s9 }
  0x1f   : > { %p404_p13 = pnand %p402_p11, %p388_p12  ;;  %p410_p1 = scmp.lt.s32.totalorder %s408_s15, %s401_s7 }
  0x21   : > { %p405_p9 = pneg %p404_p13  ;;  %p411_p2 = por %p410_p1, %p409_p10 }
  0x23   : > { %p412_p3 = pnand %p411_p2, %p405_p9 }
  0x25   : > { %415 = shalt.err (!%p412_p3)
}
  0x26   : > { %339 = dma.hbm_to_vmem [thread:$0]  (!%p559_p8), %s553_s24, 128, %s557_s26, %s115_s28  }
  0x27   : > { %p668_p0 = scmp.lt.s32.totalorder %s484_s12, 3  ;;  %p669_p4 = scmp.ge.s32.totalorder %s484_s12, 1 }
  0x28   : > { %s604_s25 = scalar_lea.hbm %s663_s1, %s324_s21  ;;  %s136_s29 = scalar_lea.vmem [#allocation4], %s323_s20 }
  0x29   : > { %p595_p5 = pnand %p669_p4, %p668_p0  ;;  %s143_s30 = sshll.u32 %s136_s29, 4  ;;  %s144_s30 = int_to_ptr.vmem [resolvable:$true] %s143_s30 }
  0x2a   : > { %s133_s24 = scalar_lea.sflag [#allocation5], %s544_s19  ;;  %s416_s26 = scalar_lea.hbm %s604_s25, 128 }
  0x2b   : > { %s670_s16 = scalar_select %p595_p5, 1, 0 }
  0x2c   : > { %p417_p9 = scmp.ne.s32.totalorder %s604_s25, %s416_s26  ;;  %s421_s21 = scalar_lea.hbm %s663_s1, 256 }
  0x2d   : > { %p422_p11 = scmp.lt.u32.totalorder %s604_s25, %s663_s1  ;;  %p423_p13 = scmp.lt.u32.totalorder %s421_s21, %s416_s26 }
  0x2e   : > { %p419_p10 = pnand %p417_p9, %p388_p12  ;;  %p425_p2 = scmp.lt.u32.totalorder %s416_s26, %s604_s25 }
  0x2f   : > { %p424_p1 = por %p423_p13, %p422_p11 }
  0x30   : > { %p420_p6 = pneg %p419_p10 }
  0x31   : > { %p426_p3 = por %p425_p2, %p424_p1 }
  0x33   : > { %p427_p0 = pnand %p426_p3, %p420_p6 }
  0x35   : > { %430 = shalt.err (!%p427_p0)
}
  0x36   : > { %s431_s19 = scalar_lea.vmem %s144_s30, 128  ;;  %s487_s20 = smov [#allocation4]  }
  0x37   : > { %p432_p4 = scmp.ne.s32.totalorder %s144_s30, %s431_s19  ;;  %s436_s5 = sshll.u32 %s487_s20, 4  ;;  %s437_s5 = int_to_ptr.vmem [resolvable:$false] %s436_s5 }
  0x38   : > { %s438_s6 = scalar_lea.vmem %s437_s5, 256  ;;  %p439_p7 = scmp.lt.s32.totalorder %s144_s30, %s437_s5 }
  0x39   : > { %p434_p9 = pnand %p432_p4, %p388_p12  ;;  %p440_p5 = scmp.lt.s32.totalorder %s438_s6, %s431_s19 }
  0x3b   : > { %p435_p10 = pneg %p434_p9  ;;  %p441_p11 = por %p440_p5, %p439_p7 }
  0x3d   : > { %p442_p13 = pnand %p441_p11, %p435_p10 }
  0x3f   : > { %445 = shalt.err (!%p442_p13)
}
  0x40   : > { %342 = dma.hbm_to_vmem [thread:$0]  (!%p559_p8), %s604_s25, 128, %s144_s30, %s133_s24  }
  0x41   : > { %p671_p6 = scmp.ne.s32.totalorder %s670_s16, 0 }
  0x42   : > { %s154_s7 = sand.u32 (!%p671_p6), 1, %s476_s10   ;;  %p672_p12 = scmp.ne.s32.totalorder (!%p671_p6), %s666_s18, 0 }
  0x43   : > { %152 = sbr.rel (%p671_p6) target bundleno = 415 (0x19f), region = 28  ;;  %s328_s8 = sshll.u32 (!%p671_p6), %s154_s7, 3 }
  0x44   : > { %s155_s9 = scalar_lea.sflag (!%p671_p6), [#allocation3], %s154_s7  ;;  %s158_s15 = scalar_lea.vmem (!%p671_p6), [#allocation2], %s328_s8 }
  0x4a   : > { %463 = dma.done.wait (%p672_p12), %s155_s9, 128  }
  0x4b   : > { %465 = vsyncadd (%p672_p12), %s155_s9, 4294967168  ;;  %s164_s22 = scalar_lea.sflag [#allocation5], %s154_s7  ;;  %s167_s23 = scalar_lea.vmem [#allocation4], %s328_s8 }
  0x4c   : > { %467 = dma.done.wait (%p672_p12), %s164_s22, 128  }
  0x4d   : > { %469 = vsyncadd (%p672_p12), %s164_s22, 4294967168  ;;  %v194_v0 = vld [vmem:[%s158_s15] sm:$0xff]  ;;  %vm198_vm0 = vcmask 261120   ;;  %v196_v1 = vld [vmem:[%s167_s23] sm:$0xff]  ;;  %p191_p7 = scmp.lt.s32.totalorder %s522_s13, 1  ;;  %vm236_vm1 = vcmask 0  }
  0x4e   : > { %v195_v2 = vmul.f32 0.25, %v194_v0  ;;  %v197_v3 = vmul.f32 0.25, %v196_v1 }
  0x4f   : > { %s678_s13 = smov (!%p191_p7, %s522_s13), 1 }
  0x50   : > { %v199_v4 = vsel %vm198_vm0, %v195_v2, -inf  ;;  %v210_v5 = vsel %vm198_vm0, %v197_v3, -inf  ;;  %s193_s16 = scalar_lea.vmem %s664_s2, %s678_s13 }
  0x51   : > { %200 = vmax.xlane.f32.xlu0 %v199_v4 }
  0x55   : > { %211 = vmax.xlane.f32.xlu0 %v210_v5 }
  0xde   : > { %v201_v6 = vpop.xlane.xlu0 %200 }
  0xdf   : > { %v202_v7 = vsub.f32 %v195_v2, %v201_v6 }
  0xe1   : > { %v203_v8 = vmul.f32 1.442695, %v202_v7 }
  0xe2   : > { %v212_v9 = vpop.xlane.xlu0 %211 }
  0xe3   : > { %376 = vpow2.f32 %v203_v8  ;;  %v213_v10 = vsub.f32 %v197_v3, %v212_v9 }
  0xe5   : > { %v214_v11 = vmul.f32 1.442695, %v213_v10  ;;  %v219_v14 = vsub.f32 %v213_v10, %v202_v7 }
  0xe7   : > { %378 = vpow2.f32 %v214_v11 }
  0xed   : > { %v377_v12 = vpop.eup %376 }
  0xee   : > { %v205_v13 = vsel %vm198_vm0, %v377_v12, 0.0 }
  0xef   : > { %206 = vadd.xlane.f32.xlu1 %v205_v13 }
  0xf1   : > { %v379_v15 = vpop.eup %378 }
  0xf2   : > { %v216_v16 = vsel %vm198_vm0, %v379_v15, 0.0  ;;  %v220_v17 = vmul.f32 %v379_v15, %v219_v14 }
  0xf3   : > { %217 = vadd.xlane.f32.xlu1 %v216_v16 }
  0xf4   : > { %v221_v18 = vsel %vm198_vm0, %v220_v17, 0.0 }
  0xf5   : > { %222 = vadd.xlane.f32.xlu0 %v221_v18 }
 0x17c   : > { %v207_v19 = vpop.xlane.xlu1 %206 }
 0x17d   : > { %380 = vlog2.f32 %v207_v19 }
 0x180   : > { %v218_v20 = vpop.xlane.xlu1 %217 }
 0x181   : > { %382 = vrcp.f32 %v218_v20 }
 0x182   : > { %384 = vlog2.f32 %v218_v20  ;;  %v223_v23 = vpop.xlane.xlu0 %222 }
 0x187   : > { %v381_v21 = vpop.eup %380 }
 0x188   : > { %v209_v25 = vmul.f32 0.6931472, %v381_v21 }
 0x18b   : > { %v383_v22 = vpop.eup %382 }
 0x18c   : > { %v385_v24 = vpop.eup %384  ;;  %v225_v26 = vmul.f32 %v383_v22, %v223_v23 }
 0x18d   : > { %v228_v27 = vmul.f32 0.6931472, %v385_v24 }
 0x18e   : > { %v226_v28 = vadd.f32 %v225_v26, %v209_v25 }
 0x190   : > { %v229_v29 = vsub.f32 %v226_v28, %v228_v27 }
 0x192   : > { %v230_v30 = vrot.slane %v229_v29, 4 }
 0x194   : > { %v231_v31 = vadd.f32 %v230_v30, %v229_v29 }
 0x196   : > { %v232_v32 = vrot.slane %v231_v31, 2 }
 0x198   : > { %v233_v33 = vadd.f32 %v232_v32, %v231_v31 }
 0x19a   : > { %v234_v34 = vrot.slane %v233_v33, 1 }
 0x19c   : > { %v235_v35 = vadd.f32 %v234_v34, %v233_v33 }
 0x19e   : > { %237 = vst.msk [vmem:[%s193_s16] sm:$0x1] %vm236_vm1, %v235_v35 }
 0x19f PF: > { %p15_p8 = scmp.ge.s32.totalorder %s525_s14, 4   ;;  %s673_s9 = smov %s476_s10 }
 0x1a0   : > { %s674_s10 = smov %s480_s11  ;;  %s675_s11 = smov %s535_s17 }
 0x1a1   : > { %s676_s12 = smov %s525_s14  ;;  %17 = sbr.rel (!%p15_p8) target bundleno = 5 (0x5), region = 81 }
 0x1a8   :  { %255 = vsyncpa [#allocation3], 1 }
 0x1a9   :  { %257 = vsyncpa [#allocation3 + $0x1], 1 }
 0x1aa   :  { %258 = vsyncpa [#allocation5], 1 }
 0x1ab   :  { %260 = vsyncpa [#allocation5 + $0x1], 1 }

</bundles_post_ra>
